<compile_context>
chip_gen: v7x
topology: tpu7x:2x2x1
jax: 0.10.0
libtpu: 0.0.40
codegen_flags: <defaults>
</compile_context>

<pallas_src>
import functools

import jax
import jax.numpy as jnp
from jax.experimental import pallas as pl
from jax.experimental.pallas import tpu as pltpu

# Sentinel coordinate for padded points: an exact power of two (exactly
# representable in bf16, lo-part == 0) so padded<->padded squared distances
# come out of the MXU identity as exactly zero, and 4*(2*2^50)^2 stays far
# below the f32 max.
_SENTINEL = 2.0 ** 50


def _round_up(x, m):
    return ((x + m - 1) // m) * m


def _pad_axis(x, axis, new_size, value=0.0):
    pad = new_size - x.shape[axis]
    if pad <= 0:
        return x
    widths = [(0, 0)] * x.ndim
    widths[axis] = (0, pad)
    return jnp.pad(x, widths, constant_values=value)


def _chamfer_kernel(a_ref, bt_ref, asq_ref, bsq_ref, rowsum_ref, colsum_ref,
                    rowmin_sc, colmin_sc, *,
                    tile_n, tile_m, n_valid, m_valid,
                    multi_m, mask_rows, mask_cols, row_acc_w):
    # a_ref   : (Bblk, tN, 3d) bf16   [A_hi | A_hi | A_lo]
    # bt_ref  : (Bblk, 3d, tM) bf16   2 * [B_hi | B_lo | B_hi]   (K, M) RHS
    # asq_ref : (Bblk, tN, 1)  f32    exact ||a_i||^2
    # bsq_ref : (Bblk, 1, tM)  f32    exact ||b_j||^2
    # rowsum_ref / colsum_ref : (Bblk, 1, 1) per-batch-block accumulators
    # rowmin_sc : (Bblk, tN, row_acc_w)  running row-min partials (over M)
    # colmin_sc : per-mi slots of (Bblk, 8, tM) running col-min partials
    ni = pl.program_id(1)
    mi = pl.program_id(2)
    last_ni = pl.num_programs(1) - 1
    last_mi = pl.num_programs(2) - 1

    @pl.when((ni == 0) & (mi == 0))
    def _():
        rowsum_ref[...] = jnp.zeros_like(rowsum_ref)
        colsum_ref[...] = jnp.zeros_like(colsum_ref)

    # Squared pairwise distances via the MXU identity
    #   sq[i, j] = ||a_i||^2 + ||b_j||^2 - 2 <a_i, b_j>
    # The cross term (including the factor 2, folded into bt) is ONE bf16
    # K=3d matmul with f32 accumulation == bf16_3x (~f32) accuracy.
    cross2 = jnp.einsum('bnk,bkm->bnm', a_ref[...], bt_ref[...],
                        preferred_element_type=jnp.float32)      # (Bblk,tN,tM)
    sq = asq_ref[...] + bsq_ref[...] - cross2
    # NOTE: the max(.,0) clamp is applied at finalize (min-then-clamp ==
    # clamp-then-min), saving one full-tile VPU pass per step.

    # ---- row-min partials: elementwise (VPU) min across 128-lane groups ----
    if row_acc_w == 128:
        rpart = sq[:, :, 0:128]
        for g in range(1, tile_m // 128):
            rpart = jnp.minimum(rpart, sq[:, :, g * 128:(g + 1) * 128])
    else:  # small path: tile_m not a multiple of 128, single grid step per bb
        rpart = jnp.min(sq, axis=2, keepdims=True)               # (Bblk,tN,1)

    @pl.when(mi == 0)
    def _():
        rowmin_sc[...] = rpart

    @pl.when(mi > 0)
    def _():
        rowmin_sc[...] = jnp.minimum(rowmin_sc[...], rpart)

    # ---- col-min partials: elementwise (VPU) min across 8-sublane groups ---
    cpart = sq[:, 0:8, :]
    for s in range(1, tile_n // 8):
        cpart = jnp.minimum(cpart, sq[:, s * 8:(s + 1) * 8, :])  # (Bblk,8,tM)

    col_view = colmin_sc.at[mi] if multi_m else colmin_sc

    @pl.when(ni == 0)
    def _():
        col_view[...] = cpart

    @pl.when(ni > 0)
    def _():
        col_view[...] = jnp.minimum(col_view[...], cpart)

    # ---- finalize rows (sqrt hoisted past the min: only tN sqrts) ----------
    @pl.when(mi == last_mi)
    def _():
        rmin = rowmin_sc[...]
        if row_acc_w > 1:
            rmin = jnp.min(rmin, axis=2, keepdims=True)          # 128->1 XLU
        r = jnp.sqrt(jnp.maximum(rmin, 0.0))                     # (Bblk,tN,1)
        if mask_rows:
            ridx = ni * tile_n + jax.lax.broadcasted_iota(jnp.int32, r.shape, 1)
            r = jnp.where(ridx < n_valid, r, 0.0)
        rowsum_ref[...] += jnp.sum(r, axis=1, keepdims=True)     # (Bblk,1,1)

    # ---- finalize cols ------------------------------------------------------
    @pl.when(ni == last_ni)
    def _():
        cmin = jnp.min(col_view[...], axis=1, keepdims=True)     # 8->1 XLU
        c = jnp.sqrt(jnp.maximum(cmin, 0.0))                     # (Bblk,1,tM)
        if mask_cols:
            cidx = mi * tile_m + jax.lax.broadcasted_iota(jnp.int32, c.shape, 2)
            c = jnp.where(cidx < m_valid, c, 0.0)
        colsum_ref[...] += jnp.sum(c, axis=2, keepdims=True)     # (Bblk,1,1)


def regularizing_loss(x_true, y_true, x_pred, y_pred):
    """Pallas implementation of RegularizingLoss.forward."""
    # Concatenation along the coordinate axis (dim=2 in PyTorch).
    A = jnp.concatenate([x_true, y_pred], axis=2).astype(jnp.float32)   # (B,N,D)
    Bm = jnp.concatenate([y_true, x_pred], axis=2).astype(jnp.float32)  # (B,M,D)

    bsz, n, d = A.shape
    m = Bm.shape[1]
    kd = 3 * d

    # --- tile selection (full extent when small, large bounded tiles when big)
    if n <= 512:
        tile_n = _round_up(n, 8)
        n_pad = tile_n
    else:
        tile_n = 512
        n_pad = _round_up(n, tile_n)
    if m <= 1024:
        tile_m = _round_up(m, 8)
        m_pad = tile_m
    else:
        tile_m = 1024                       # multiple of 128 -> lane-aligned
        m_pad = _round_up(m, tile_m)

    # Small-problem path: pack several batch elements per grid step, but keep
    # the (parallel) batch grid axis >= 2 when bsz >= 2 for megacore sharding.
    # TODO(synk): for truly tiny N,M (<=128) plain fused XLA is competitive.
    if tile_n * tile_m <= 128 * 128:
        bblk = max(1, min(8, bsz // 2))
    else:
        bblk = 1
    bsz_pad = _round_up(bsz, bblk)

    # Sentinel-pad the point axes (padded<->padded distances become exactly 0,
    # padded<->real distances huge); zero-pad the batch axis (contributes 0).
    A_p = _pad_axis(A, 1, n_pad, _SENTINEL)
    B_p = _pad_axis(Bm, 1, m_pad, _SENTINEL)
    A_p = _pad_axis(A_p, 0, bsz_pad, 0.0)
    B_p = _pad_axis(B_p, 0, bsz_pad, 0.0)

    # Exact squared norms in f32 (cheap O(B*(N+M)) XLA work in the wrapper).
    asq = jnp.sum(A_p * A_p, axis=2, keepdims=True)              # (Bp, Np, 1)
    bsq = jnp.sum(B_p * B_p, axis=2)[:, None, :]                 # (Bp, 1, Mp)

    # bf16 hi/lo split so ONE K=3d bf16 MXU matmul reproduces the f32 cross
    # term:  <a,b> ~= a_hi.b_hi + a_hi.b_lo + a_lo.b_hi  (bf16_3x accuracy).
    A_hi = A_p.astype(jnp.bfloat16)
    A_lo = (A_p - A_hi.astype(jnp.float32)).astype(jnp.bfloat16)
    B_hi = B_p.astype(jnp.bfloat16)
    B_lo = (B_p - B_hi.astype(jnp.float32)).astype(jnp.bfloat16)
    A3 = jnp.concatenate([A_hi, A_hi, A_lo], axis=2)             # (Bp, Np, 3d)
    B3 = jnp.concatenate([B_hi, B_lo, B_hi], axis=2)             # (Bp, Mp, 3d)
    # Fold the "2 *" of the distance identity into B (exact power-of-2 scale)
    # and transpose so the kernel sees a lane-dense (K, M) MXU RHS.
    Bt3 = jnp.transpose(B3 * jnp.bfloat16(2.0), (0, 2, 1))       # (Bp, 3d, Mp)

    num_bb = bsz_pad // bblk
    num_ni = n_pad // tile_n
    num_mi = m_pad // tile_m
    multi_m = num_mi > 1
    mask_rows = n_pad != n          # cheap (tN,1) mask, finalize only
    mask_cols = m_pad != m          # cheap (1,tM) mask, finalize only
    row_acc_w = 128 if (tile_m % 128 == 0) else 1

    if multi_m:
        # 8-sublane slots: no sublane-padding waste, zero per-step column XLU.
        # Footprint is 32 B per B-point (bblk == 1 on this path); fits the
        # 32 MiB scoped VMEM even for ~1e5-1e6 points (v7x-safe).
        col_scratch = pltpu.VMEM((num_mi, bblk, 8, tile_m), jnp.float32)
    else:
        col_scratch = pltpu.VMEM((bblk, 8, tile_m), jnp.float32)

    kernel = functools.partial(
        _chamfer_kernel, tile_n=tile_n, tile_m=tile_m,
        n_valid=n, m_valid=m, multi_m=multi_m,
        mask_rows=mask_rows, mask_cols=mask_cols, row_acc_w=row_acc_w)

    rowsum, colsum = pl.pallas_call(
        kernel,
        out_shape=(jax.ShapeDtypeStruct((bsz_pad, 1, 1), jnp.float32),
                   jax.ShapeDtypeStruct((bsz_pad, 1, 1), jnp.float32)),
        grid_spec=pltpu.PrefetchScalarGridSpec(
            num_scalar_prefetch=0,
            grid=(num_bb, num_ni, num_mi),
            in_specs=[
                pl.BlockSpec((bblk, tile_n, kd), lambda bb, ni, mi: (bb, ni, 0)),
                pl.BlockSpec((bblk, kd, tile_m), lambda bb, ni, mi: (bb, 0, mi)),
                pl.BlockSpec((bblk, tile_n, 1), lambda bb, ni, mi: (bb, ni, 0)),
                pl.BlockSpec((bblk, 1, tile_m), lambda bb, ni, mi: (bb, 0, mi)),
            ],
            out_specs=(
                pl.BlockSpec((bblk, 1, 1), lambda bb, ni, mi: (bb, 0, 0)),
                pl.BlockSpec((bblk, 1, 1), lambda bb, ni, mi: (bb, 0, 0)),
            ),
            scratch_shapes=(
                pltpu.VMEM((bblk, tile_n, row_acc_w), jnp.float32),  # row-min
                col_scratch,                                         # col-min
            ),
        ),
        compiler_params=pltpu.CompilerParams(
            # batch axis fully independent (per-batch outputs) -> megacore
            # sharding on 2-TC parts; N/M axes carry accumulator state.
            dimension_semantics=("parallel", "arbitrary", "arbitrary"),
            vmem_limit_bytes=32 * 1024 * 1024,
        ),
    )(A3, Bt3, asq, bsq)

    # Padded batch entries and sentinel rows/cols contribute exactly 0.
    loss = 0.5 * (jnp.sum(rowsum) / (bsz * n) + jnp.sum(colsum) / (bsz * m))
    return loss


def _reference_loss(x_true, y_true, x_pred, y_pred):
    # Pure-JAX reference of the PyTorch semantics, for validation only.
    A = jnp.concatenate([x_true, y_pred], axis=2)
    Bm = jnp.concatenate([y_true, x_pred], axis=2)
    diff = A[:, :, None, :] - Bm[:, None, :, :]          # (B, N, M, D)
    dist = jnp.sqrt(jnp.sum(diff * diff, axis=-1))       # (B, N, M)
    minrow = jnp.min(dist, axis=2)                       # (B, N)
    mincol = jnp.min(dist, axis=1)                       # (B, M)
    return (jnp.mean(minrow) + jnp.mean(mincol)) * 0.5


if __name__ == "__main__":
    key = jax.random.PRNGKey(0)
    k1, k2, k3, k4, k5, k6, k7, k8 = jax.random.split(key, 8)

    # Small shapes: batch=2, 8 points, 2 coordinate components per tensor.
    B, N, C = 2, 8, 2
    x_true = jax.random.normal(k1, (B, N, C), dtype=jnp.float32)
    y_true = jax.random.normal(k2, (B, N, C), dtype=jnp.float32)
    x_pred = jax.random.normal(k3, (B, N, C), dtype=jnp.float32)
    y_pred = jax.random.normal(k4, (B, N, C), dtype=jnp.float32)

    loss = jax.block_until_ready(regularizing_loss(x_true, y_true, x_pred, y_pred))
    ref = jax.block_until_ready(_reference_loss(x_true, y_true, x_pred, y_pred))
    assert jnp.allclose(loss, ref, rtol=1e-3, atol=1e-3), (loss, ref)

    # Ragged config exercises the sentinel-padding path (N != M, odd sizes).
    B2, N2, M2, C2 = 3, 10, 13, 2
    xt2 = jax.random.normal(k5, (B2, N2, C2), dtype=jnp.float32)
    yp2 = jax.random.normal(k6, (B2, N2, C2), dtype=jnp.float32)
    yt2 = jax.random.normal(k7, (B2, M2, C2), dtype=jnp.float32)
    xp2 = jax.random.normal(k8, (B2, M2, C2), dtype=jnp.float32)
    loss2 = jax.block_until_ready(regularizing_loss(xt2, yt2, xp2, yp2))
    ref2 = jax.block_until_ready(_reference_loss(xt2, yt2, xp2, yp2))
    assert jnp.allclose(loss2, ref2, rtol=1e-3, atol=1e-3), (loss2, ref2)

    print("KERNEL_OK")
</pallas_src>

<mosaic_0001>
module attributes {stable_mosaic.version = 11 : i64} {
  func.func @_chamfer_kernel(%arg0: i32, %arg1: i32, %arg2: i32, %arg3: memref<1x8x12xbf16, #tpu.memory_space<vmem>>, %arg4: memref<1x12x8xbf16, #tpu.memory_space<vmem>>, %arg5: memref<1x8x1xf32, #tpu.memory_space<vmem>>, %arg6: memref<1x1x8xf32, #tpu.memory_space<vmem>>, %arg7: memref<1x1x1xf32, #tpu.memory_space<vmem>>, %arg8: memref<1x1x1xf32, #tpu.memory_space<vmem>>, %arg9: memref<1x8x1xf32, #tpu.memory_space<vmem>>, %arg10: memref<1x8x8xf32, #tpu.memory_space<vmem>>) attributes {dimension_semantics = [#tpu.dimension_semantics<parallel>, #tpu.dimension_semantics<arbitrary>, #tpu.dimension_semantics<arbitrary>], iteration_bounds = array<i64: 2, 1, 1>, scalar_prefetch = 0 : i64, scratch_operands = 2 : i64, tpu.core_type = #tpu.core_type<tc>, window_params = [{transform_indices = @transform_0, window_bounds = array<i64: 1, 8, 12>}, {transform_indices = @transform_1, window_bounds = array<i64: 1, 12, 8>}, {transform_indices = @transform_2, window_bounds = array<i64: 1, 8, 1>}, {transform_indices = @transform_3, window_bounds = array<i64: 1, 1, 8>}, {transform_indices = @transform_4, window_bounds = array<i64: 1, 1, 1>}, {transform_indices = @transform_5, window_bounds = array<i64: 1, 1, 1>}]} {
    %c0_i32 = arith.constant 0 : i32
    %0 = arith.cmpi eq, %arg1, %c0_i32 : i32
    %c0_i32_0 = arith.constant 0 : i32
    %1 = arith.cmpi eq, %arg2, %c0_i32_0 : i32
    %2 = arith.andi %0, %1 : i1
    %3 = arith.extui %2 : i1 to i32
    %c0_i32_1 = arith.constant 0 : i32
    %4 = arith.cmpi ne, %3, %c0_i32_1 : i32
    scf.if %4 {
      %cst_26 = arith.constant 0.000000e+00 : f32
      %34 = vector.broadcast %cst_26 : f32 to vector<1x1x1xf32>
      %c0_27 = arith.constant 0 : index
      %c0_28 = arith.constant 0 : index
      %c0_29 = arith.constant 0 : index
      %35 = vector.load %arg7[%c0_27, %c0_28, %c0_29] : memref<1x1x1xf32, #tpu.memory_space<vmem>>, vector<1x1x1xf32>
      tpu.vector_store %arg7[%c0_27, %c0_28, %c0_29], %34 {strides = array<i32>} : memref<1x1x1xf32, #tpu.memory_space<vmem>>, vector<1x1x1xf32>,
      %cst_30 = arith.constant 0.000000e+00 : f32
      %36 = vector.broadcast %cst_30 : f32 to vector<1x1x1xf32>
      %c0_31 = arith.constant 0 : index
      %c0_32 = arith.constant 0 : index
      %c0_33 = arith.constant 0 : index
      %37 = vector.load %arg8[%c0_31, %c0_32, %c0_33] : memref<1x1x1xf32, #tpu.memory_space<vmem>>, vector<1x1x1xf32>
      tpu.vector_store %arg8[%c0_31, %c0_32, %c0_33], %36 {strides = array<i32>} : memref<1x1x1xf32, #tpu.memory_space<vmem>>, vector<1x1x1xf32>,
    } else {
    }
    %c0 = arith.constant 0 : index
    %c0_2 = arith.constant 0 : index
    %c0_3 = arith.constant 0 : index
    %5 = vector.load %arg3[%c0, %c0_2, %c0_3] : memref<1x8x12xbf16, #tpu.memory_space<vmem>>, vector<1x8x12xbf16>
    %c0_4 = arith.constant 0 : index
    %c0_5 = arith.constant 0 : index
    %c0_6 = arith.constant 0 : index
    %6 = vector.load %arg4[%c0_4, %c0_5, %c0_6] : memref<1x12x8xbf16, #tpu.memory_space<vmem>>, vector<1x12x8xbf16>
    "tpu.trace_start"() <{level = 10 : i32, message = "bnk,bkm->bnm"}> : () -> ()
    %cst = arith.constant dense<0.000000e+00> : vector<1x8x8xf32>
    %7 = tpu.matmul %5, %6, %cst {dimension_numbers = #tpu.dot_dimension_numbers<[2], [1], [1], [2], [0, 0, 0, 1, 1, 2], [0], [0]>} : vector<1x8x12xbf16>, vector<1x12x8xbf16>, vector<1x8x8xf32> -> vector<1x8x8xf32>
    "tpu.trace_stop"() : () -> ()
    %c0_7 = arith.constant 0 : index
    %c0_8 = arith.constant 0 : index
    %c0_9 = arith.constant 0 : index
    %8 = vector.load %arg5[%c0_7, %c0_8, %c0_9] : memref<1x8x1xf32, #tpu.memory_space<vmem>>, vector<1x8x1xf32>
    %c0_10 = arith.constant 0 : index
    %c0_11 = arith.constant 0 : index
    %c0_12 = arith.constant 0 : index
    %9 = vector.load %arg6[%c0_10, %c0_11, %c0_12] : memref<1x1x8xf32, #tpu.memory_space<vmem>>, vector<1x1x8xf32>
    %10 = vector.broadcast %8 : vector<1x8x1xf32> to vector<1x8x8xf32>
    %11 = vector.broadcast %9 : vector<1x1x8xf32> to vector<1x8x8xf32>
    %12 = arith.addf %10, %11 : vector<1x8x8xf32>
    %13 = arith.subf %12, %7 : vector<1x8x8xf32>
    %cst_13 = arith.constant dense<0x7F800000> : vector<1x8xf32>
    %14 = vector.multi_reduction <minimumf>, %13, %cst_13 [2] : vector<1x8x8xf32> to vector<1x8xf32>
    %15 = vector.shape_cast %14 : vector<1x8xf32> to vector<1x8x1xf32>
    %c0_i32_14 = arith.constant 0 : i32
    %16 = arith.cmpi eq, %arg2, %c0_i32_14 : i32
    %17 = arith.extui %16 : i1 to i32
    %c0_i32_15 = arith.constant 0 : i32
    %18 = arith.cmpi ne, %17, %c0_i32_15 : i32
    scf.if %18 {
      %c0_26 = arith.constant 0 : index
      %c0_27 = arith.constant 0 : index
      %c0_28 = arith.constant 0 : index
      %34 = vector.load %arg9[%c0_26, %c0_27, %c0_28] : memref<1x8x1xf32, #tpu.memory_space<vmem>>, vector<1x8x1xf32>
      tpu.vector_store %arg9[%c0_26, %c0_27, %c0_28], %15 {strides = array<i32>} : memref<1x8x1xf32, #tpu.memory_space<vmem>>, vector<1x8x1xf32>,
    } else {
    }
    %c0_i32_16 = arith.constant 0 : i32
    %19 = arith.cmpi sgt, %arg2, %c0_i32_16 : i32
    %20 = arith.extui %19 : i1 to i32
    %c0_i32_17 = arith.constant 0 : i32
    %21 = arith.cmpi ne, %20, %c0_i32_17 : i32
    scf.if %21 {
      %c0_26 = arith.constant 0 : index
      %c0_27 = arith.constant 0 : index
      %c0_28 = arith.constant 0 : index
      %34 = vector.load %arg9[%c0_26, %c0_27, %c0_28] : memref<1x8x1xf32, #tpu.memory_space<vmem>>, vector<1x8x1xf32>
      %35 = arith.minimumf %34, %15 : vector<1x8x1xf32>
      %c0_29 = arith.constant 0 : index
      %c0_30 = arith.constant 0 : index
      %c0_31 = arith.constant 0 : index
      %36 = vector.load %arg9[%c0_29, %c0_30, %c0_31] : memref<1x8x1xf32, #tpu.memory_space<vmem>>, vector<1x8x1xf32>
      tpu.vector_store %arg9[%c0_29, %c0_30, %c0_31], %35 {strides = array<i32>} : memref<1x8x1xf32, #tpu.memory_space<vmem>>, vector<1x8x1xf32>,
    } else {
    }
    %c0_i32_18 = arith.constant 0 : i32
    %22 = arith.cmpi eq, %arg1, %c0_i32_18 : i32
    %23 = arith.extui %22 : i1 to i32
    %c0_i32_19 = arith.constant 0 : i32
    %24 = arith.cmpi ne, %23, %c0_i32_19 : i32
    scf.if %24 {
      %c0_26 = arith.constant 0 : index
      %c0_27 = arith.constant 0 : index
      %c0_28 = arith.constant 0 : index
      %34 = vector.load %arg10[%c0_26, %c0_27, %c0_28] : memref<1x8x8xf32, #tpu.memory_space<vmem>>, vector<1x8x8xf32>
      tpu.vector_store %arg10[%c0_26, %c0_27, %c0_28], %13 {strides = array<i32>} : memref<1x8x8xf32, #tpu.memory_space<vmem>>, vector<1x8x8xf32>,
    } else {
    }
    %c0_i32_20 = arith.constant 0 : i32
    %25 = arith.cmpi sgt, %arg1, %c0_i32_20 : i32
    %26 = arith.extui %25 : i1 to i32
    %c0_i32_21 = arith.constant 0 : i32
    %27 = arith.cmpi ne, %26, %c0_i32_21 : i32
    scf.if %27 {
      %c0_26 = arith.constant 0 : index
      %c0_27 = arith.constant 0 : index
      %c0_28 = arith.constant 0 : index
      %34 = vector.load %arg10[%c0_26, %c0_27, %c0_28] : memref<1x8x8xf32, #tpu.memory_space<vmem>>, vector<1x8x8xf32>
      %35 = arith.minimumf %34, %13 : vector<1x8x8xf32>
      %c0_29 = arith.constant 0 : index
      %c0_30 = arith.constant 0 : index
      %c0_31 = arith.constant 0 : index
      %36 = vector.load %arg10[%c0_29, %c0_30, %c0_31] : memref<1x8x8xf32, #tpu.memory_space<vmem>>, vector<1x8x8xf32>
      tpu.vector_store %arg10[%c0_29, %c0_30, %c0_31], %35 {strides = array<i32>} : memref<1x8x8xf32, #tpu.memory_space<vmem>>, vector<1x8x8xf32>,
    } else {
    }
    %c0_i32_22 = arith.constant 0 : i32
    %28 = arith.cmpi eq, %arg2, %c0_i32_22 : i32
    %29 = arith.extui %28 : i1 to i32
    %c0_i32_23 = arith.constant 0 : i32
    %30 = arith.cmpi ne, %29, %c0_i32_23 : i32
    scf.if %30 {
      %c0_26 = arith.constant 0 : index
      %c0_27 = arith.constant 0 : index
      %c0_28 = arith.constant 0 : index
      %34 = vector.load %arg9[%c0_26, %c0_27, %c0_28] : memref<1x8x1xf32, #tpu.memory_space<vmem>>, vector<1x8x1xf32>
      %cst_29 = arith.constant 0.000000e+00 : f32
      %35 = vector.broadcast %cst_29 : f32 to vector<1x8x1xf32>
      %36 = arith.maximumf %34, %35 : vector<1x8x1xf32>
      %37 = math.sqrt %36 : vector<1x8x1xf32>
      %c0_30 = arith.constant 0 : index
      %c0_31 = arith.constant 0 : index
      %c0_32 = arith.constant 0 : index
      %38 = vector.load %arg7[%c0_30, %c0_31, %c0_32] : memref<1x1x1xf32, #tpu.memory_space<vmem>>, vector<1x1x1xf32>
      %cst_33 = arith.constant dense<0.000000e+00> : vector<1x1xf32>
      %39 = vector.multi_reduction <add>, %37, %cst_33 [1] : vector<1x8x1xf32> to vector<1x1xf32>
      %40 = vector.shape_cast %39 : vector<1x1xf32> to vector<1x1x1xf32>
      %41 = arith.addf %38, %40 : vector<1x1x1xf32>
      %c0_34 = arith.constant 0 : index
      %c0_35 = arith.constant 0 : index
      %c0_36 = arith.constant 0 : index
      %42 = vector.load %arg7[%c0_34, %c0_35, %c0_36] : memref<1x1x1xf32, #tpu.memory_space<vmem>>, vector<1x1x1xf32>
      tpu.vector_store %arg7[%c0_34, %c0_35, %c0_36], %41 {strides = array<i32>} : memref<1x1x1xf32, #tpu.memory_space<vmem>>, vector<1x1x1xf32>,
    } else {
    }
    %c0_i32_24 = arith.constant 0 : i32
    %31 = arith.cmpi eq, %arg1, %c0_i32_24 : i32
    %32 = arith.extui %31 : i1 to i32
    %c0_i32_25 = arith.constant 0 : i32
    %33 = arith.cmpi ne, %32, %c0_i32_25 : i32
    scf.if %33 {
      %c0_26 = arith.constant 0 : index
      %c0_27 = arith.constant 0 : index
      %c0_28 = arith.constant 0 : index
      %34 = vector.load %arg10[%c0_26, %c0_27, %c0_28] : memref<1x8x8xf32, #tpu.memory_space<vmem>>, vector<1x8x8xf32>
      %cst_29 = arith.constant dense<0x7F800000> : vector<1x8xf32>
      %35 = vector.multi_reduction <minimumf>, %34, %cst_29 [1] : vector<1x8x8xf32> to vector<1x8xf32>
      %36 = vector.shape_cast %35 : vector<1x8xf32> to vector<1x1x8xf32>
      %cst_30 = arith.constant 0.000000e+00 : f32
      %37 = vector.broadcast %cst_30 : f32 to vector<1x1x8xf32>
      %38 = arith.maximumf %36, %37 : vector<1x1x8xf32>
      %39 = math.sqrt %38 : vector<1x1x8xf32>
      %c0_31 = arith.constant 0 : index
      %c0_32 = arith.constant 0 : index
      %c0_33 = arith.constant 0 : index
      %40 = vector.load %arg8[%c0_31, %c0_32, %c0_33] : memref<1x1x1xf32, #tpu.memory_space<vmem>>, vector<1x1x1xf32>
      %cst_34 = arith.constant dense<0.000000e+00> : vector<1x1xf32>
      %41 = vector.multi_reduction <add>, %39, %cst_34 [2] : vector<1x1x8xf32> to vector<1x1xf32>
      %42 = vector.shape_cast %41 : vector<1x1xf32> to vector<1x1x1xf32>
      %43 = arith.addf %40, %42 : vector<1x1x1xf32>
      %c0_35 = arith.constant 0 : index
      %c0_36 = arith.constant 0 : index
      %c0_37 = arith.constant 0 : index
      %44 = vector.load %arg8[%c0_35, %c0_36, %c0_37] : memref<1x1x1xf32, #tpu.memory_space<vmem>>, vector<1x1x1xf32>
      tpu.vector_store %arg8[%c0_35, %c0_36, %c0_37], %43 {strides = array<i32>} : memref<1x1x1xf32, #tpu.memory_space<vmem>>, vector<1x1x1xf32>,
    } else {
    }
    return
  }
  func.func @transform_0(%arg0: i32, %arg1: i32, %arg2: i32) -> (i32, i32, i32) {
    %c0_i32 = arith.constant 0 : i32
    %c0_i32_0 = arith.constant 0 : i32
    return %arg0, %arg1, %c0_i32 : i32, i32, i32
  }
  func.func @transform_1(%arg0: i32, %arg1: i32, %arg2: i32) -> (i32, i32, i32) {
    %c0_i32 = arith.constant 0 : i32
    %c0_i32_0 = arith.constant 0 : i32
    return %arg0, %c0_i32, %arg2 : i32, i32, i32
  }
  func.func @transform_2(%arg0: i32, %arg1: i32, %arg2: i32) -> (i32, i32, i32) {
    %c0_i32 = arith.constant 0 : i32
    %c0_i32_0 = arith.constant 0 : i32
    return %arg0, %arg1, %c0_i32 : i32, i32, i32
  }
  func.func @transform_3(%arg0: i32, %arg1: i32, %arg2: i32) -> (i32, i32, i32) {
    %c0_i32 = arith.constant 0 : i32
    %c0_i32_0 = arith.constant 0 : i32
    return %arg0, %c0_i32, %arg2 : i32, i32, i32
  }
  func.func @transform_4(%arg0: i32, %arg1: i32, %arg2: i32) -> (i32, i32, i32) {
    %c0_i32 = arith.constant 0 : i32
    %c0_i32_0 = arith.constant 0 : i32
    %c0_i32_1 = arith.constant 0 : i32
    return %arg0, %c0_i32, %c0_i32_0 : i32, i32, i32
  }
  func.func @transform_5(%arg0: i32, %arg1: i32, %arg2: i32) -> (i32, i32, i32) {
    %c0_i32 = arith.constant 0 : i32
    %c0_i32_0 = arith.constant 0 : i32
    %c0_i32_1 = arith.constant 0 : i32
    return %arg0, %c0_i32, %c0_i32_0 : i32, i32, i32
  }
}

</mosaic_0001>

<bundles_post_ra>
// kernel: tpu_custom_call.1
= control target key start
LH: loop header
LB: loop body
LE: loop exit
PB: predicated region body
PF: predicated region fallthrough
CT: control target
= control target key end

     0   :  { %s744_s18 = smov 0   ;;  %s746_s19 = smov 0   ;;  %s809_s0 = inlined_call_operand.vmem [shape: bf16[2,8,12], index: 0, kind: input, shape index: {}]   ;;  %s810_s1 = inlined_call_operand.vmem [shape: bf16[2,12,8], index: 1, kind: input, shape index: {}]   ;;  %s811_s2 = inlined_call_operand.vmem [shape: f32[2,8,1], index: 2, kind: input, shape index: {}]   ;;  %s812_s3 = inlined_call_operand.vmem [shape: f32[2,1,8], index: 3, kind: input, shape index: {}]   ;;  %s813_s4 = inlined_call_operand.vmem [shape: f32[2,1,1], index: 4, kind: output, shape index: {0}]   ;;  %s814_s5 = inlined_call_operand.vmem [shape: f32[2,1,1], index: 5, kind: output, shape index: {1}]  }
   0x1   :  { %s748_s20 = smov 0  }
   0x2 LB: > { %s35_s21 = sadd.s32 1, %s705_s19  ;;  %p635_p0 = scmp.ge.s32.totalorder %s709_s20, 1  ;;  %s709_s20 = sphi %s748_s20, %s16_s20   ;;  %s705_s19 = sphi %s746_s19, %s816_s19   ;;  %s701_s18 = sphi %s744_s18, %s815_s18  }
   0x3   : > { %p37_p1 = scmp.ge.s32.totalorder %s35_s21, 2  ;;  %p255_p2 = scmp.lt.s32.totalorder %s709_s20, 3 }
   0x5   : > { %s818_s21 = smov (%p37_p1, %s35_s21), 0  ;;  %p256_p3 = pnand %p635_p0, %p255_p2 }
   0x6   : > { %p307_p4 = scmp.lt.s32.totalorder (!%p256_p3), %s701_s18, 1  ;;  %v711_v0 = vmov (!%p256_p3), 0.0   ;;  %vm712_vm0 = vmmov (!%p256_p3), 0   ;;  %vm348_vm1 = vcmask (!%p256_p3), 0   ;;  %v713_v1 = vmov (!%p256_p3), 0  }
   0x7   : > { %259 = sbr.rel (%p256_p3) target bundleno = 420 (0x1a4), region = 36  ;;  %648 = vmatprep.subr.bf16.mxu0 (!%p256_p3), %v711_v0  ;;  %650 = vmatprep.mubr.msk.bf16.mxu0 (!%p256_p3), %vm712_vm0, %v711_v0  ;;  %vm363_vm2 = vcmask (!%p256_p3), 1045504   ;;  %vm359_vm3 = vcmask (!%p256_p3), 97280   ;;  %vm422_vm4 = vcmask (!%p256_p3), 64512   ;;  %vm429_vm7 = vcmask (!%p256_p3), 7168  }
   0x8   : > { %681 = vset.pattern.permute.xlu0 (!%p256_p3), %v713_v1 }
   0xe   : > { %s820_s18 = smov (!%p307_p4, %s701_s18), 1 }
   0xf   : > { %s768_s24 = scalar_lea.vmem %s813_s4, %s820_s18  ;;  %s645_s25 = sshll.u32 %s820_s18, 3 }
  0x10   : > { %349 = vst.msk [vmem:[%s768_s24] sm:$0x1] %vm348_vm1, %v711_v0  ;;  %s321_s28 = scalar_lea.vmem %s810_s1, %s645_s25  ;;  %s636_s29 = sshll.u32 %s820_s18, 2 }
  0x11   : > { %v682_v2 = vld [vmem:[%s321_s28] sm:$0x3f]   ;;  %s313_s7 = scalar_lea.vmem %s809_s0, %s636_s29  ;;  %s328_s10 = scalar_lea.vmem %s811_s2, %s645_s25 }
  0x12   : > { %v407_v3 = vld [vmem:[%s328_s10] sm:$0xff]  ;;  %v365_v4 = vsel %vm363_vm2, %v682_v2, 0  ;;  %s334_s13 = scalar_lea.vmem %s812_s3, %s820_s18  ;;  %s340_s16 = scalar_lea.vmem %s814_s5, %s820_s18 }
  0x13   : > { %411 = vperm.xlu0 %681, %v407_v3   ;;  %649 = vmatpush3.bf16.msra.mxu0 %v365_v4  ;;  %v351_v5 = vld [vmem:[%s313_s7] sm:$0xf]  ;;  %350 = vst.msk [vmem:[%s340_s16] sm:$0x1] %vm348_vm1, %v711_v0 }
  0x14   : > { %v642_v6 = vld [vmem:[%s334_s13] ss:$0 sm:$0xff] }
  0x16   : > { %651 = vmatmul.mubr.msk.bf16.vlgmr.msra.gmra.mrb[0].mxu0 %vm359_vm3, %v351_v5 }
  0x17   : > { %v462_v44 = vld [vmem:[%s768_s24] sm:$0x1] }
  0x1a   : > { %v493_v45 = vld [vmem:[%s340_s16] sm:$0x1] }
  0x92   : > { %v412_v7 = vpop.permute.xlu0 %411 }
  0x93   : > { %v420_v8 = vadd.f32 %v642_v6, %v412_v7 }
  0xe9   : > { %v401_v9 = vpop.f32.mrb[0].mxu0 }
  0xea   : > { %v421_v10 = vsub.f32 %v420_v8, %v401_v9  ;;  %v652_v11 = vpop.f32.mrb[1].mxu0 }
  0xeb   : > { %v404_v12 = vpop.f32.mrb[2].mxu0 }
  0xec   : > { %442 = vst.msk [vmem:[#allocation3] sm:$0xff] %vm422_vm4, %v421_v10  ;;  %v653_v13 = vpop.f32.mrb[3].mxu0  ;;  %v423_v14 = vsel %vm422_vm4, %v421_v10, inf }
  0xed   : > { %424 = vmin.xlane.f32.xlu0 %v423_v14 }
  0xf3   : > { %v477_v15 = vld [vmem:[#allocation3] sm:$0xff] }
  0xf4   : > { %v478_v16 = vsel %vm422_vm4, %v477_v15, inf }
  0xf5   : > { %v479_v17 = vrot.slane %v478_v16, 4 }
  0xf7   : > { %v480_v18 = vmin.f32 %v478_v16, %v479_v17 }
  0xf9   : > { %v481_v19 = vrot.slane %v480_v18, 2 }
  0xfb   : > { %v482_v20 = vmin.f32 %v480_v18, %v481_v19 }
  0xfd   : > { %v483_v21 = vrot.slane %v482_v20, 1 }
  0xff   : > { %v484_v22 = vmin.f32 %v482_v20, %v483_v21 }
 0x101   : > { %v485_v23 = vmax.f32 %v484_v22, 0.0 }
 0x103   : > { %683 = vrsqrt.f32 %v485_v23  ;;  %vm488_vm5 = vcmp.eq.f32.partialorder %v485_v23, inf  ;;  %v491_v26 = vand.u32 2147483648, %v485_v23  ;;  %vm490_vm6 = vcmp.eq.f32.partialorder %v485_v23, 0.0 }
 0x10d   : > { %v684_v24 = vpop.eup %683 }
 0x10e   : > { %v487_v25 = vmul.f32 %v684_v24, %v485_v23 }
 0x110   : > { %v489_v27 = vsel %vm488_vm5, %v485_v23, %v487_v25 }
 0x111   : > { %v492_v28 = vsel %vm490_vm6, %v491_v26, %v489_v27 }
 0x112   : > { %v494_v29 = vsel %vm422_vm4, %v492_v28, 0.0 }
 0x113   : > { %495 = vadd.xlane.f32.xlu1 %v494_v29 }
 0x17a   : > { %v425_v30 = vpop.xlane.xlu0 %424 }
 0x17b   : > { %430 = vst.msk [vmem:[#allocation2] sm:$0xff] %vm429_vm7, %v425_v30 }
 0x182   : > { %v453_v31 = vld [vmem:[#allocation2] sm:$0xff] }
 0x183   : > { %v454_v32 = vmax.f32 %v453_v31, 0.0 }
 0x185   : > { %685 = vrsqrt.f32 %v454_v32  ;;  %vm457_vm8 = vcmp.eq.f32.partialorder %v454_v32, inf  ;;  %v460_v35 = vand.u32 2147483648, %v454_v32  ;;  %vm459_vm9 = vcmp.eq.f32.partialorder %v454_v32, 0.0 }
 0x18f   : > { %v686_v33 = vpop.eup %685 }
 0x190   : > { %v456_v34 = vmul.f32 %v686_v33, %v454_v32 }
 0x192   : > { %v458_v36 = vsel %vm457_vm8, %v454_v32, %v456_v34 }
 0x193   : > { %v461_v37 = vsel %vm459_vm9, %v460_v35, %v458_v36 }
 0x194   : > { %v464_v38 = vsel %vm429_vm7, %v461_v37, 0.0 }
 0x195   : > { %v465_v39 = vrot.slane %v464_v38, 4 }
 0x197   : > { %v466_v40 = vadd.f32 %v465_v39, %v464_v38 }
 0x199   : > { %v467_v41 = vrot.slane %v466_v40, 2 }
 0x19b   : > { %v468_v42 = vadd.f32 %v467_v41, %v466_v40 }
 0x19d   : > { %v469_v43 = vrot.slane %v468_v42, 1 }
 0x19f   : > { %v470_v46 = vadd.f32 %v469_v43, %v468_v42 }
 0x1a0   : > { %v496_v47 = vpop.xlane.xlu1 %495 }
 0x1a1   : > { %v471_v48 = vadd.f32 %v470_v46, %v462_v44  ;;  %v497_v49 = vadd.f32 %v496_v47, %v493_v45 }
 0x1a3   : > { %473 = vst.msk [vmem:[%s768_s24] sm:$0x1] %vm348_vm1, %v471_v48  ;;  %499 = vst.msk [vmem:[%s340_s16] sm:$0x1] %vm348_vm1, %v497_v49 }
 0x1a4 PF: > { %s16_s20 = sadd.s32 1, %s709_s20   ;;  %s815_s18 = smov %s705_s19 }
 0x1a5   : > { %p13_p5 = scmp.ge.s32.totalorder %s16_s20, 4   ;;  %s816_s19 = smov %s818_s21 }
 0x1a7   :  { %15 = sbr.rel (!%p13_p5) target bundleno = 2 (0x2), region = 115 }

</bundles_post_ra>
